<compile_context>
chip_gen: v7x
topology: tpu7x:2x2x1
jax: 0.10.0
libtpu: 0.0.40
codegen_flags: <defaults>
</compile_context>

<pallas_src>
import math

import jax
import jax.numpy as jnp
from jax import lax
from jax.experimental import pallas as pl
from jax.experimental.pallas import tpu as pltpu

# ----------------------------- configuration --------------------------------
SHEET = (8, 16)                 # sheet_size (rows, cols)  -> N = 128 neurons
N = SHEET[0] * SHEET[1]
CONNECTIVITY_STD = 2.0
SYNAPSES_PER_NEURON = 8
NUM_CLASSES = 10
NUM_TIMESTEPS = 8
HIDDEN = 64
HIDDEN_PAD = 128                # lane-dense padded hidden width
CLASSES_PAD = 128               # lane-dense padded class width
BATCH = 2
C_IN = 3

# Bias packing below relies on all three bias rows being 128 lanes wide.
assert N == 128 and HIDDEN_PAD == 128 and CLASSES_PAD == 128


# ------------------------- parameter construction ---------------------------
def build_params(key):
    """Deterministically build dense equivalents of the module's parameters."""
    k_off, k_val, k_w1, k_b1, k_w2, k_b2 = jax.random.split(key, 6)
    H, Wc = SHEET

    ii, jj = jnp.meshgrid(jnp.arange(H), jnp.arange(Wc), indexing="ij")
    coords = jnp.stack([ii.reshape(-1), jj.reshape(-1)], axis=0)  # (2, N)

    # Gaussian synapse offsets around each neuron (as in __init__), clamped.
    # TODO(synk): .astype(int32) truncates toward zero; torch's .long() on a
    # float tensor does the same, so connectivity construction matches.
    offs = (
        jax.random.normal(k_off, (2, N, SYNAPSES_PER_NEURON)) * CONNECTIVITY_STD
        + coords[:, :, None].astype(jnp.float32)
    ).astype(jnp.int32)
    lo = jnp.array([0, 0], jnp.int32).reshape(2, 1, 1)
    hi = jnp.array([H - 1, Wc - 1], jnp.int32).reshape(2, 1, 1)
    offs = jnp.clip(offs, lo, hi)

    # Append the self (root) connection, as in the reference construction.
    syn2d = jnp.concatenate([offs, coords[:, :, None]], axis=2)  # (2, N, S+1)
    rows = syn2d[0] * Wc + syn2d[1]                              # target (synapse) idx
    root = coords[0] * Wc + coords[1]                            # (N,)
    cols = jnp.broadcast_to(root[:, None], rows.shape)           # source (root) idx

    vals = jax.random.normal(k_val, rows.shape) * math.sqrt(2.0 / SYNAPSES_PER_NEURON)

    # Coalesce duplicate (row, col) entries by summation -> dense (N, N) matrix.
    W_dense = (
        jnp.zeros((N, N), jnp.float32)
        .at[rows.reshape(-1), cols.reshape(-1)]
        .add(vals.reshape(-1))
    )

    # out_block: Linear(N, 64) -> relu -> Linear(64, num_classes), zero-padded
    # to lane-dense widths (padded rows/cols are exactly 0, so the logical
    # [:HIDDEN]/[:NUM_CLASSES] slices are unchanged).
    W1 = jax.random.normal(k_w1, (N, HIDDEN), jnp.float32) * (1.0 / math.sqrt(N))
    b1 = jax.random.uniform(k_b1, (HIDDEN,), jnp.float32,
                            -1.0 / math.sqrt(N), 1.0 / math.sqrt(N))
    W2 = jax.random.normal(k_w2, (HIDDEN, NUM_CLASSES), jnp.float32) * (1.0 / math.sqrt(HIDDEN))
    b2 = jax.random.uniform(k_b2, (NUM_CLASSES,), jnp.float32,
                            -1.0 / math.sqrt(HIDDEN), 1.0 / math.sqrt(HIDDEN))

    W1p = jnp.zeros((N, HIDDEN_PAD), jnp.float32).at[:, :HIDDEN].set(W1)
    W2p = jnp.zeros((HIDDEN_PAD, CLASSES_PAD), jnp.float32).at[:HIDDEN, :NUM_CLASSES].set(W2)

    # Single packed bias array (one DMA instead of three):
    #   row 0: recurrent-cell bias (module uses zeros(N, 1))
    #   row 1: out_block Linear1 bias (padded to 128)
    #   row 2: out_block Linear2 bias (padded to 128)
    bpack = jnp.zeros((8, N), jnp.float32)
    bpack = bpack.at[1, :HIDDEN].set(b1)
    bpack = bpack.at[2, :NUM_CLASSES].set(b2)

    # Weights stored as bf16 MXU operands (review item); elementwise stays f32.
    return (
        W_dense.T.astype(jnp.bfloat16),   # kernel computes x @ W.T == (W @ x.T).T
        bpack,
        W1p.astype(jnp.bfloat16),
        W2p.astype(jnp.bfloat16),
    )


# ------------------------------ Pallas kernel --------------------------------
def make_rnn_kernel(unroll):
    def rnn_kernel(x0_ref, wt_ref, bpack_ref, w1_ref, w2_ref, out_ref, c_ref):
        x0 = x0_ref[...]                      # (TB, N) f32: initial state == input_x
        wt = wt_ref[...]                      # (N, N) bf16 = W.T (loaded once)
        b = bpack_ref[0:1, :]                 # (1, N) recurrent bias, f32

        # Hoisted loop-invariant: (x0 + x) @ Wt + b == x @ Wt + (x0 @ Wt + b).
        # Kept in VMEM scratch so it streams via vld instead of pinning vregs.
        c_ref[...] = (
            jnp.dot(x0.astype(jnp.bfloat16), wt, preferred_element_type=jnp.float32)
            + b
        )

        def body(_, x):
            y = jnp.dot(x.astype(jnp.bfloat16), wt,
                        preferred_element_type=jnp.float32)
            return jnp.maximum(y + c_ref[...], 0.0)      # add / relu in f32

        # Small tiles: fully unroll the serial chain (latency-bound).
        # Large tiles: rolled loop (throughput-bound) keeps vreg pressure down.
        x = lax.fori_loop(0, NUM_TIMESTEPS, body, x0, unroll=unroll)

        # out_block head (lane-dense padded widths), bf16 dots / f32 epilogue.
        b1 = bpack_ref[1:2, :]
        b2 = bpack_ref[2:3, :]
        h = jnp.maximum(
            jnp.dot(x.astype(jnp.bfloat16), w1_ref[...],
                    preferred_element_type=jnp.float32) + b1,
            0.0,
        )
        out_ref[...] = (
            jnp.dot(h.astype(jnp.bfloat16), w2_ref[...],
                    preferred_element_type=jnp.float32) + b2
        )

    return rnn_kernel


def _batch_tiling(b):
    """Pick (tile_rows, num_tiles): minimal padding; >=2 tiles once B > 64 so the
    'parallel' grid axis can shard across v7x's two TensorCores."""
    if b <= 64:
        return 8 * math.ceil(b / 8), 1
    cap = 512                                   # amortize MXU fill/drain; ~0.5 MB/tile
    nb = max(2, math.ceil(b / cap))
    if nb % 2:
        nb += 1                                 # even tile count -> balanced across 2 TCs
    tb = 8 * math.ceil(math.ceil(b / nb) / 8)
    nb = math.ceil(b / tb)
    return tb, nb


@jax.jit
def topographical_rnn(x, Wt, bpack, W1p, W2p):
    # Glue: NCHW -> (B, N) via flatten(2).mean(dim=1), exactly as the module.
    if x.ndim > 2:
        x = x.reshape(x.shape[0], x.shape[1], -1).mean(axis=1)
    x = x.astype(jnp.float32)

    batch = x.shape[0]
    tb, nb = _batch_tiling(batch)
    b_pad = nb * tb
    if b_pad != batch:
        x = jnp.pad(x, ((0, b_pad - batch), (0, 0)))

    kernel = make_rnn_kernel(unroll=(tb <= 128))

    out = pl.pallas_call(
        kernel,
        out_shape=jax.ShapeDtypeStruct((b_pad, CLASSES_PAD), jnp.float32),
        grid=(nb,),
        in_specs=[
            pl.BlockSpec((tb, N), lambda i: (i, 0)),            # batch-tiled state (f32)
            pl.BlockSpec((N, N), lambda i: (0, 0)),             # Wt (bf16): VMEM-resident
            pl.BlockSpec((8, N), lambda i: (0, 0)),             # packed biases (f32)
            pl.BlockSpec((N, HIDDEN_PAD), lambda i: (0, 0)),    # W1 (bf16, padded)
            pl.BlockSpec((HIDDEN_PAD, CLASSES_PAD), lambda i: (0, 0)),  # W2 (bf16, padded)
        ],
        out_specs=pl.BlockSpec((tb, CLASSES_PAD), lambda i: (i, 0)),
        scratch_shapes=[pltpu.VMEM((tb, N), jnp.float32)],      # loop-invariant c
        compiler_params=pltpu.CompilerParams(
            dimension_semantics=("parallel",),
        ),
    )(x, Wt, bpack, W1p, W2p)

    # Strip batch and class padding outside the kernel (exact).
    return out[:batch, :NUM_CLASSES]


# ---------------------------------- main -------------------------------------
if __name__ == "__main__":
    key = jax.random.PRNGKey(0)
    k_x, k_params = jax.random.split(key)
    params = build_params(k_params)

    # Example input: (batch, channels, H, W) consistent with sheet_size=(8, 16).
    x = jax.random.normal(k_x, (BATCH, C_IN, SHEET[0], SHEET[1]), jnp.float32)
    out = jax.block_until_ready(topographical_rnn(x, *params))
    assert out.shape == (BATCH, NUM_CLASSES), out.shape

    # Exercise the multi-tile (grid >= 2, parallel axis) and rolled-loop paths.
    for b in (96, 300):
        xb = jax.random.normal(jax.random.PRNGKey(b),
                               (b, C_IN, SHEET[0], SHEET[1]), jnp.float32)
        ob = jax.block_until_ready(topographical_rnn(xb, *params))
        assert ob.shape == (b, NUM_CLASSES), ob.shape

    print("KERNEL_OK")
</pallas_src>

<mosaic_0001>
module attributes {stable_mosaic.version = 11 : i64} {
  func.func @rnn_kernel(%arg0: i32, %arg1: memref<8x128xf32, #tpu.memory_space<vmem>>, %arg2: memref<128x128xbf16, #tpu.memory_space<vmem>>, %arg3: memref<8x128xf32, #tpu.memory_space<vmem>>, %arg4: memref<128x128xbf16, #tpu.memory_space<vmem>>, %arg5: memref<128x128xbf16, #tpu.memory_space<vmem>>, %arg6: memref<8x128xf32, #tpu.memory_space<vmem>>, %arg7: memref<8x128xf32, #tpu.memory_space<vmem>>) attributes {dimension_semantics = [#tpu.dimension_semantics<parallel>], iteration_bounds = array<i64: 1>, scalar_prefetch = 0 : i64, scratch_operands = 1 : i64, tpu.core_type = #tpu.core_type<tc>, window_params = [{transform_indices = @transform_0, window_bounds = array<i64: 8, 128>}, {pipeline_mode = #tpu.pipeline_mode<synchronous>, transform_indices = @transform_1, window_bounds = array<i64: 128, 128>}, {pipeline_mode = #tpu.pipeline_mode<synchronous>, transform_indices = @transform_2, window_bounds = array<i64: 8, 128>}, {pipeline_mode = #tpu.pipeline_mode<synchronous>, transform_indices = @transform_3, window_bounds = array<i64: 128, 128>}, {pipeline_mode = #tpu.pipeline_mode<synchronous>, transform_indices = @transform_4, window_bounds = array<i64: 128, 128>}, {transform_indices = @transform_5, window_bounds = array<i64: 8, 128>}]} {
    %c0 = arith.constant 0 : index
    %c0_0 = arith.constant 0 : index
    %0 = vector.load %arg1[%c0, %c0_0] : memref<8x128xf32, #tpu.memory_space<vmem>>, vector<8x128xf32>
    %c0_1 = arith.constant 0 : index
    %c0_2 = arith.constant 0 : index
    %1 = vector.load %arg2[%c0_1, %c0_2] : memref<128x128xbf16, #tpu.memory_space<vmem>>, vector<128x128xbf16>
    %c0_3 = arith.constant 0 : index
    %c0_4 = arith.constant 0 : index
    %2 = vector.load %arg3[%c0_3, %c0_4] : memref<8x128xf32, #tpu.memory_space<vmem>>, vector<1x128xf32>
    %3 = arith.truncf %0 : vector<8x128xf32> to vector<8x128xbf16>
    %cst = arith.constant dense<0.000000e+00> : vector<8x128xf32>
    %4 = tpu.matmul %3, %1, %cst {dimension_numbers = #tpu.dot_dimension_numbers<[1], [0], [0], [1], [0, 0, 1, 1], [], []>} : vector<8x128xbf16>, vector<128x128xbf16>, vector<8x128xf32> -> vector<8x128xf32>
    %5 = vector.broadcast %2 : vector<1x128xf32> to vector<8x128xf32>
    %6 = arith.addf %4, %5 : vector<8x128xf32>
    %c0_5 = arith.constant 0 : index
    %c0_6 = arith.constant 0 : index
    %7 = vector.load %arg7[%c0_5, %c0_6] : memref<8x128xf32, #tpu.memory_space<vmem>>, vector<8x128xf32>
    tpu.vector_store %arg7[%c0_5, %c0_6], %6 {strides = array<i32>} : memref<8x128xf32, #tpu.memory_space<vmem>>, vector<8x128xf32>,
    %c0_i32 = arith.constant 0 : i32
    %8 = arith.truncf %0 : vector<8x128xf32> to vector<8x128xbf16>
    %cst_7 = arith.constant dense<0.000000e+00> : vector<8x128xf32>
    %9 = tpu.matmul %8, %1, %cst_7 {dimension_numbers = #tpu.dot_dimension_numbers<[1], [0], [0], [1], [0, 0, 1, 1], [], []>} : vector<8x128xbf16>, vector<128x128xbf16>, vector<8x128xf32> -> vector<8x128xf32>
    %c0_8 = arith.constant 0 : index
    %c0_9 = arith.constant 0 : index
    %10 = vector.load %arg7[%c0_8, %c0_9] : memref<8x128xf32, #tpu.memory_space<vmem>>, vector<8x128xf32>
    %11 = arith.addf %9, %10 : vector<8x128xf32>
    %cst_10 = arith.constant 0.000000e+00 : f32
    %12 = vector.broadcast %cst_10 : f32 to vector<8x128xf32>
    %13 = arith.maximumf %11, %12 : vector<8x128xf32>
    %c1_i32 = arith.constant 1 : i32
    %14 = arith.truncf %13 : vector<8x128xf32> to vector<8x128xbf16>
    %cst_11 = arith.constant dense<0.000000e+00> : vector<8x128xf32>
    %15 = tpu.matmul %14, %1, %cst_11 {dimension_numbers = #tpu.dot_dimension_numbers<[1], [0], [0], [1], [0, 0, 1, 1], [], []>} : vector<8x128xbf16>, vector<128x128xbf16>, vector<8x128xf32> -> vector<8x128xf32>
    %c0_12 = arith.constant 0 : index
    %c0_13 = arith.constant 0 : index
    %16 = vector.load %arg7[%c0_12, %c0_13] : memref<8x128xf32, #tpu.memory_space<vmem>>, vector<8x128xf32>
    %17 = arith.addf %15, %16 : vector<8x128xf32>
    %cst_14 = arith.constant 0.000000e+00 : f32
    %18 = vector.broadcast %cst_14 : f32 to vector<8x128xf32>
    %19 = arith.maximumf %17, %18 : vector<8x128xf32>
    %c2_i32 = arith.constant 2 : i32
    %20 = arith.truncf %19 : vector<8x128xf32> to vector<8x128xbf16>
    %cst_15 = arith.constant dense<0.000000e+00> : vector<8x128xf32>
    %21 = tpu.matmul %20, %1, %cst_15 {dimension_numbers = #tpu.dot_dimension_numbers<[1], [0], [0], [1], [0, 0, 1, 1], [], []>} : vector<8x128xbf16>, vector<128x128xbf16>, vector<8x128xf32> -> vector<8x128xf32>
    %c0_16 = arith.constant 0 : index
    %c0_17 = arith.constant 0 : index
    %22 = vector.load %arg7[%c0_16, %c0_17] : memref<8x128xf32, #tpu.memory_space<vmem>>, vector<8x128xf32>
    %23 = arith.addf %21, %22 : vector<8x128xf32>
    %cst_18 = arith.constant 0.000000e+00 : f32
    %24 = vector.broadcast %cst_18 : f32 to vector<8x128xf32>
    %25 = arith.maximumf %23, %24 : vector<8x128xf32>
    %c3_i32 = arith.constant 3 : i32
    %26 = arith.truncf %25 : vector<8x128xf32> to vector<8x128xbf16>
    %cst_19 = arith.constant dense<0.000000e+00> : vector<8x128xf32>
    %27 = tpu.matmul %26, %1, %cst_19 {dimension_numbers = #tpu.dot_dimension_numbers<[1], [0], [0], [1], [0, 0, 1, 1], [], []>} : vector<8x128xbf16>, vector<128x128xbf16>, vector<8x128xf32> -> vector<8x128xf32>
    %c0_20 = arith.constant 0 : index
    %c0_21 = arith.constant 0 : index
    %28 = vector.load %arg7[%c0_20, %c0_21] : memref<8x128xf32, #tpu.memory_space<vmem>>, vector<8x128xf32>
    %29 = arith.addf %27, %28 : vector<8x128xf32>
    %cst_22 = arith.constant 0.000000e+00 : f32
    %30 = vector.broadcast %cst_22 : f32 to vector<8x128xf32>
    %31 = arith.maximumf %29, %30 : vector<8x128xf32>
    %c4_i32 = arith.constant 4 : i32
    %32 = arith.truncf %31 : vector<8x128xf32> to vector<8x128xbf16>
    %cst_23 = arith.constant dense<0.000000e+00> : vector<8x128xf32>
    %33 = tpu.matmul %32, %1, %cst_23 {dimension_numbers = #tpu.dot_dimension_numbers<[1], [0], [0], [1], [0, 0, 1, 1], [], []>} : vector<8x128xbf16>, vector<128x128xbf16>, vector<8x128xf32> -> vector<8x128xf32>
    %c0_24 = arith.constant 0 : index
    %c0_25 = arith.constant 0 : index
    %34 = vector.load %arg7[%c0_24, %c0_25] : memref<8x128xf32, #tpu.memory_space<vmem>>, vector<8x128xf32>
    %35 = arith.addf %33, %34 : vector<8x128xf32>
    %cst_26 = arith.constant 0.000000e+00 : f32
    %36 = vector.broadcast %cst_26 : f32 to vector<8x128xf32>
    %37 = arith.maximumf %35, %36 : vector<8x128xf32>
    %c5_i32 = arith.constant 5 : i32
    %38 = arith.truncf %37 : vector<8x128xf32> to vector<8x128xbf16>
    %cst_27 = arith.constant dense<0.000000e+00> : vector<8x128xf32>
    %39 = tpu.matmul %38, %1, %cst_27 {dimension_numbers = #tpu.dot_dimension_numbers<[1], [0], [0], [1], [0, 0, 1, 1], [], []>} : vector<8x128xbf16>, vector<128x128xbf16>, vector<8x128xf32> -> vector<8x128xf32>
    %c0_28 = arith.constant 0 : index
    %c0_29 = arith.constant 0 : index
    %40 = vector.load %arg7[%c0_28, %c0_29] : memref<8x128xf32, #tpu.memory_space<vmem>>, vector<8x128xf32>
    %41 = arith.addf %39, %40 : vector<8x128xf32>
    %cst_30 = arith.constant 0.000000e+00 : f32
    %42 = vector.broadcast %cst_30 : f32 to vector<8x128xf32>
    %43 = arith.maximumf %41, %42 : vector<8x128xf32>
    %c6_i32 = arith.constant 6 : i32
    %44 = arith.truncf %43 : vector<8x128xf32> to vector<8x128xbf16>
    %cst_31 = arith.constant dense<0.000000e+00> : vector<8x128xf32>
    %45 = tpu.matmul %44, %1, %cst_31 {dimension_numbers = #tpu.dot_dimension_numbers<[1], [0], [0], [1], [0, 0, 1, 1], [], []>} : vector<8x128xbf16>, vector<128x128xbf16>, vector<8x128xf32> -> vector<8x128xf32>
    %c0_32 = arith.constant 0 : index
    %c0_33 = arith.constant 0 : index
    %46 = vector.load %arg7[%c0_32, %c0_33] : memref<8x128xf32, #tpu.memory_space<vmem>>, vector<8x128xf32>
    %47 = arith.addf %45, %46 : vector<8x128xf32>
    %cst_34 = arith.constant 0.000000e+00 : f32
    %48 = vector.broadcast %cst_34 : f32 to vector<8x128xf32>
    %49 = arith.maximumf %47, %48 : vector<8x128xf32>
    %c7_i32 = arith.constant 7 : i32
    %50 = arith.truncf %49 : vector<8x128xf32> to vector<8x128xbf16>
    %cst_35 = arith.constant dense<0.000000e+00> : vector<8x128xf32>
    %51 = tpu.matmul %50, %1, %cst_35 {dimension_numbers = #tpu.dot_dimension_numbers<[1], [0], [0], [1], [0, 0, 1, 1], [], []>} : vector<8x128xbf16>, vector<128x128xbf16>, vector<8x128xf32> -> vector<8x128xf32>
    %c0_36 = arith.constant 0 : index
    %c0_37 = arith.constant 0 : index
    %52 = vector.load %arg7[%c0_36, %c0_37] : memref<8x128xf32, #tpu.memory_space<vmem>>, vector<8x128xf32>
    %53 = arith.addf %51, %52 : vector<8x128xf32>
    %cst_38 = arith.constant 0.000000e+00 : f32
    %54 = vector.broadcast %cst_38 : f32 to vector<8x128xf32>
    %55 = arith.maximumf %53, %54 : vector<8x128xf32>
    %c1 = arith.constant 1 : index
    %c0_39 = arith.constant 0 : index
    %56 = vector.load %arg3[%c1, %c0_39] : memref<8x128xf32, #tpu.memory_space<vmem>>, vector<1x128xf32>
    %c2 = arith.constant 2 : index
    %c0_40 = arith.constant 0 : index
    %57 = vector.load %arg3[%c2, %c0_40] : memref<8x128xf32, #tpu.memory_space<vmem>>, vector<1x128xf32>
    %58 = arith.truncf %55 : vector<8x128xf32> to vector<8x128xbf16>
    %c0_41 = arith.constant 0 : index
    %c0_42 = arith.constant 0 : index
    %59 = vector.load %arg4[%c0_41, %c0_42] : memref<128x128xbf16, #tpu.memory_space<vmem>>, vector<128x128xbf16>
    %cst_43 = arith.constant dense<0.000000e+00> : vector<8x128xf32>
    %60 = tpu.matmul %58, %59, %cst_43 {dimension_numbers = #tpu.dot_dimension_numbers<[1], [0], [0], [1], [0, 0, 1, 1], [], []>} : vector<8x128xbf16>, vector<128x128xbf16>, vector<8x128xf32> -> vector<8x128xf32>
    %61 = vector.broadcast %56 : vector<1x128xf32> to vector<8x128xf32>
    %62 = arith.addf %60, %61 : vector<8x128xf32>
    %cst_44 = arith.constant 0.000000e+00 : f32
    %63 = vector.broadcast %cst_44 : f32 to vector<8x128xf32>
    %64 = arith.maximumf %62, %63 : vector<8x128xf32>
    %65 = arith.truncf %64 : vector<8x128xf32> to vector<8x128xbf16>
    %c0_45 = arith.constant 0 : index
    %c0_46 = arith.constant 0 : index
    %66 = vector.load %arg5[%c0_45, %c0_46] : memref<128x128xbf16, #tpu.memory_space<vmem>>, vector<128x128xbf16>
    %cst_47 = arith.constant dense<0.000000e+00> : vector<8x128xf32>
    %67 = tpu.matmul %65, %66, %cst_47 {dimension_numbers = #tpu.dot_dimension_numbers<[1], [0], [0], [1], [0, 0, 1, 1], [], []>} : vector<8x128xbf16>, vector<128x128xbf16>, vector<8x128xf32> -> vector<8x128xf32>
    %68 = vector.broadcast %57 : vector<1x128xf32> to vector<8x128xf32>
    %69 = arith.addf %67, %68 : vector<8x128xf32>
    %c0_48 = arith.constant 0 : index
    %c0_49 = arith.constant 0 : index
    %70 = vector.load %arg6[%c0_48, %c0_49] : memref<8x128xf32, #tpu.memory_space<vmem>>, vector<8x128xf32>
    tpu.vector_store %arg6[%c0_48, %c0_49], %69 {strides = array<i32>} : memref<8x128xf32, #tpu.memory_space<vmem>>, vector<8x128xf32>,
    return
  }
  func.func @transform_0(%arg0: i32) -> (i32, i32) {
    %c0_i32 = arith.constant 0 : i32
    %c0_i32_0 = arith.constant 0 : i32
    return %arg0, %c0_i32 : i32, i32
  }
  func.func @transform_1(%arg0: i32) -> (i32, i32) {
    %c0_i32 = arith.constant 0 : i32
    %c0_i32_0 = arith.constant 0 : i32
    %c0_i32_1 = arith.constant 0 : i32
    return %c0_i32, %c0_i32_0 : i32, i32
  }
  func.func @transform_2(%arg0: i32) -> (i32, i32) {
    %c0_i32 = arith.constant 0 : i32
    %c0_i32_0 = arith.constant 0 : i32
    %c0_i32_1 = arith.constant 0 : i32
    return %c0_i32, %c0_i32_0 : i32, i32
  }
  func.func @transform_3(%arg0: i32) -> (i32, i32) {
    %c0_i32 = arith.constant 0 : i32
    %c0_i32_0 = arith.constant 0 : i32
    %c0_i32_1 = arith.constant 0 : i32
    return %c0_i32, %c0_i32_0 : i32, i32
  }
  func.func @transform_4(%arg0: i32) -> (i32, i32) {
    %c0_i32 = arith.constant 0 : i32
    %c0_i32_0 = arith.constant 0 : i32
    %c0_i32_1 = arith.constant 0 : i32
    return %c0_i32, %c0_i32_0 : i32, i32
  }
  func.func @transform_5(%arg0: i32) -> (i32, i32) {
    %c0_i32 = arith.constant 0 : i32
    %c0_i32_0 = arith.constant 0 : i32
    return %arg0, %c0_i32 : i32, i32
  }
}

</mosaic_0001>

<bundles_post_ra>
// kernel: topographical_rnn.1
= control target key start
LH: loop header
LB: loop body
LE: loop exit
PB: predicated region body
PF: predicated region fallthrough
CT: control target
= control target key end

     0   :  { %10 = vsyncpa [#allocation4], 0  ;;  %s1476_s0 = inlined_call_operand.vmem [shape: f32[8,128], index: 0, kind: input, shape index: {}]   ;;  %s1477_s1 = inlined_call_operand.vmem [shape: bf16[128,128], index: 1, kind: input, shape index: {}]   ;;  %s1478_s2 = inlined_call_operand.hbm [shape: f32[8,128], index: 2, kind: input, shape index: {}]   ;;  %s1479_s3 = inlined_call_operand.vmem [shape: bf16[128,128], index: 3, kind: input, shape index: {}]   ;;  %s1480_s4 = inlined_call_operand.hbm [shape: bf16[128,128], index: 4, kind: input, shape index: {}]   ;;  %s1481_s5 = inlined_call_operand.vmem [shape: f32[8,128], index: 5, kind: output, shape index: {}]  }
   0x1   :  { %11 = vsyncpa [#allocation6], 0  ;;  %s1147_s18 = smov [#allocation3]   ;;  %s1148_s20 = smov [#allocation5]  }
   0x2   :  { %s22_s19 = sshll.u32 %s1147_s18, 4  ;;  %s33_s21 = sshll.u32 %s1148_s20, 4  ;;  %s23_s19 = int_to_ptr.vmem [resolvable:$true] %s22_s19  ;;  %s1183_s21 = int_to_ptr.vmem [resolvable:$true] %s33_s21 }
   0x3   :  { %s1099_s24 = scalar_lea.hbm %s1478_s2, 128 }
   0x4   :  { %p1100_p0 = scmp.ne.s32.totalorder %s1478_s2, %s1099_s24  ;;  %p1103_p1 = scmp.lt.u32.totalorder %s1099_s24, %s1478_s2 }
   0x6   :  { %p1105_p2 = pnand %p1103_p1, %p1100_p0 }
   0x8   :  { %1108 = shalt.err (!%p1105_p2)
}
   0x9   :  { %s1109_s29 = scalar_lea.vmem %s23_s19, 128  ;;  %p1114_p4 = scmp.lt.s32.totalorder %s23_s19, %s23_s19 }
   0xa   :  { %p1110_p3 = scmp.ne.s32.totalorder %s23_s19, %s1109_s29  ;;  %p1115_p5 = scmp.lt.s32.totalorder %s1109_s29, %s1109_s29 }
   0xc   :  { %p1116_p6 = por %p1115_p5, %p1114_p4 }
   0xe   :  { %p1117_p7 = pnand %p1116_p6, %p1110_p3 }
  0x10   :  { %1120 = shalt.err (!%p1117_p7)
}
  0x11   :  { %25 = dma.hbm_to_vmem [thread:$0]  %s1478_s2, 128, %s23_s19, [#allocation4]  }
  0x12   :  { %s1121_s9 = scalar_lea.hbm %s1480_s4, 1024 }
  0x13   :  { %p1122_p8 = scmp.ne.s32.totalorder %s1480_s4, %s1121_s9  ;;  %p1125_p9 = scmp.lt.u32.totalorder %s1121_s9, %s1480_s4 }
  0x15   :  { %p1127_p10 = pnand %p1125_p9, %p1122_p8 }
  0x17   :  { %1130 = shalt.err (!%p1127_p10)
}
  0x18   :  { %s1131_s14 = scalar_lea.vmem %s1183_s21, 1024  ;;  %p1136_p12 = scmp.lt.s32.totalorder %s1183_s21, %s1183_s21 }
  0x19   :  { %p1132_p11 = scmp.ne.s32.totalorder %s1183_s21, %s1131_s14  ;;  %p1137_p13 = scmp.lt.s32.totalorder %s1131_s14, %s1131_s14 }
  0x1b   :  { %p1138_p0 = por %p1137_p13, %p1136_p12 }
  0x1d   :  { %p1139_p1 = pnand %p1138_p0, %p1132_p11 }
  0x1f   :  { %1142 = shalt.err (!%p1139_p1)
}
  0x20   :  { %s1149_s2 = smov 64   ;;  %s1150_s15 = smov 4  }
  0x21   :  { %39 = dma.hbm_to_vmem [thread:$0]  %s1480_s4, 1024, %s1183_s21, [#allocation6], %s1149_s2, %s1149_s2, %s1150_s15  }
  0x22   :  { %1143 = dma.done.wait [#allocation4], 128  }
  0x23   :  { %1144 = vsyncadd [#allocation4], 4294967168 }
  0x24   :  { %1145 = dma.done.wait [#allocation6], 1024  }
  0x25   :  { %1146 = vsyncadd [#allocation6], 4294966272  ;;  %v1151_v0 = vmov 0.0   ;;  %vm1152_vm0 = vmmov 0   ;;  %v1223_v1 = vld [vmem:[%s1477_s1] sm:$0xff]   ;;  %v1230_v2 = vld [vmem:[%s1477_s1 + $0x8] sm:$0xff]  }
  0x26   :  { %849 = vmatprep.subr.bf16.mxu0 %v1151_v0  ;;  %869 = vmatprep.subr.bf16.mxu1 %v1151_v0  ;;  %v1239_v3 = vld [vmem:[%s1477_s1 + $0x10] sm:$0xff]   ;;  %v1246_v4 = vld [vmem:[%s1477_s1 + $0x18] sm:$0xff]   ;;  %v1255_v5 = vld [vmem:[%s1477_s1 + $0x20] sm:$0xff]  }
  0x27   :  { %865 = vmatprep.mubr.msk.bf16.mxu0 %vm1152_vm0, %v1151_v0  ;;  %885 = vmatprep.mubr.msk.bf16.mxu1 %vm1152_vm0, %v1151_v0  ;;  %v1264_v6 = vld [vmem:[%s1477_s1 + $0x28] sm:$0xff]   ;;  %v1275_v7 = vld [vmem:[%s1477_s1 + $0x30] sm:$0xff]   ;;  %v1284_v8 = vld [vmem:[%s1477_s1 + $0x38] sm:$0xff]  }
  0x28   :  { %850 = vmatpush3.bf16.msra.mxu0 %v1223_v1  ;;  %870 = vmatpush3.bf16.msra.mxu1 %v1223_v1  ;;  %v47_v9 = vld [vmem:[%s1476_s0] sm:$0xff]  ;;  %v1084_v60 = vld [vmem:[%s1479_s3 + $0x8] sm:$0xff]   ;;  %v1085_v61 = vld [vmem:[%s1479_s3 + $0x10] sm:$0xff]  }
  0x29   :  { %851 = vmatprep.subr.bf16.mxu0 %v1151_v0  ;;  %871 = vmatprep.subr.bf16.mxu1 %v1151_v0  ;;  %v65_v10 = vpack.c.bf16 %v47_v9, %v47_v9  ;;  %v723_v11 = vld [vmem:[#allocation3] ss:$0 sm:$0xff]  ;;  %v1086_v62 = vld [vmem:[%s1479_s3 + $0x18] sm:$0xff]   ;;  %v1089_v9 = vld [vmem:[%s1479_s3 + $0x30] sm:$0xff]  }
  0x2a   :  { %v1083_v59 = vld [vmem:[%s1479_s3] sm:$0xff]  }
  0x2b   :  { %v1087_v63 = vld [vmem:[%s1479_s3 + $0x20] sm:$0xff]  }
  0x2c   :  { %852 = vmatpush3.bf16.msra.mxu0 %v1230_v2  ;;  %872 = vmatpush3.bf16.msra.mxu1 %v1230_v2 }
  0x2d   :  { %853 = vmatprep.subr.bf16.mxu0 %v1151_v0  ;;  %873 = vmatprep.subr.bf16.mxu1 %v1151_v0 }
  0x30   :  { %854 = vmatpush3.bf16.msra.mxu0 %v1239_v3  ;;  %874 = vmatpush3.bf16.msra.mxu1 %v1239_v3 }
  0x31   :  { %855 = vmatprep.subr.bf16.mxu0 %v1151_v0  ;;  %875 = vmatprep.subr.bf16.mxu1 %v1151_v0 }
  0x34   :  { %856 = vmatpush3.bf16.msra.mxu0 %v1246_v4  ;;  %876 = vmatpush3.bf16.msra.mxu1 %v1246_v4 }
  0x35   :  { %857 = vmatprep.subr.bf16.mxu0 %v1151_v0  ;;  %877 = vmatprep.subr.bf16.mxu1 %v1151_v0 }
  0x38   :  { %858 = vmatpush3.bf16.msra.mxu0 %v1255_v5  ;;  %878 = vmatpush3.bf16.msra.mxu1 %v1255_v5 }
  0x39   :  { %859 = vmatprep.subr.bf16.mxu0 %v1151_v0  ;;  %879 = vmatprep.subr.bf16.mxu1 %v1151_v0 }
  0x3c   :  { %860 = vmatpush3.bf16.msra.mxu0 %v1264_v6  ;;  %880 = vmatpush3.bf16.msra.mxu1 %v1264_v6 }
  0x3d   :  { %861 = vmatprep.subr.bf16.mxu0 %v1151_v0  ;;  %881 = vmatprep.subr.bf16.mxu1 %v1151_v0 }
  0x40   :  { %862 = vmatpush3.bf16.msra.mxu0 %v1275_v7  ;;  %882 = vmatpush3.bf16.msra.mxu1 %v1275_v7 }
  0x41   :  { %863 = vmatprep.subr.bf16.mxu0 %v1151_v0  ;;  %883 = vmatprep.subr.bf16.mxu1 %v1151_v0 }
  0x44   :  { %864 = vmatpush3.bf16.msra.mxu0 %v1284_v8  ;;  %884 = vmatpush3.bf16.msra.mxu1 %v1284_v8 }
  0x45   :  { %889 = vmatprep.subr.bf16.mxu0 %v1151_v0  ;;  %909 = vmatprep.subr.bf16.mxu1 %v1151_v0 }
  0x47   :  { %866 = vmatmul.mubr.bf16.vlgmr.msra.gmra.mrb[0].mxu0 %v65_v10  ;;  %886 = vmatmul.mubr.bf16.vlgmr.msra.gmra.mrb[0].mxu1 %v65_v10  ;;  %v1090_v10 = vld [vmem:[%s1479_s3 + $0x38] sm:$0xff]  }
  0x48   :  { %890 = vmatpush3.bf16.msra.mxu0 %v1223_v1  ;;  %905 = vmatprep.mubr.msk.bf16.mxu0 %vm1152_vm0, %v1151_v0 }
  0x49   :  { %891 = vmatprep.subr.bf16.mxu0 %v1151_v0  ;;  %910 = vmatpush3.bf16.msra.mxu1 %v1223_v1 }
  0x4a   :  { %911 = vmatprep.subr.bf16.mxu1 %v1151_v0  ;;  %925 = vmatprep.mubr.msk.bf16.mxu1 %vm1152_vm0, %v1151_v0 }
  0x4c   :  { %892 = vmatpush3.bf16.msra.mxu0 %v1230_v2 }
  0x4d   :  { %893 = vmatprep.subr.bf16.mxu0 %v1151_v0  ;;  %912 = vmatpush3.bf16.msra.mxu1 %v1230_v2 }
  0x4e   :  { %913 = vmatprep.subr.bf16.mxu1 %v1151_v0 }
  0x50   :  { %894 = vmatpush3.bf16.msra.mxu0 %v1239_v3 }
  0x51   :  { %895 = vmatprep.subr.bf16.mxu0 %v1151_v0  ;;  %914 = vmatpush3.bf16.msra.mxu1 %v1239_v3 }
  0x52   :  { %915 = vmatprep.subr.bf16.mxu1 %v1151_v0 }
  0x54   :  { %896 = vmatpush3.bf16.msra.mxu0 %v1246_v4 }
  0x55   :  { %897 = vmatprep.subr.bf16.mxu0 %v1151_v0  ;;  %916 = vmatpush3.bf16.msra.mxu1 %v1246_v4 }
  0x56   :  { %917 = vmatprep.subr.bf16.mxu1 %v1151_v0 }
  0x58   :  { %898 = vmatpush3.bf16.msra.mxu0 %v1255_v5 }
  0x59   :  { %899 = vmatprep.subr.bf16.mxu0 %v1151_v0  ;;  %918 = vmatpush3.bf16.msra.mxu1 %v1255_v5 }
  0x5a   :  { %919 = vmatprep.subr.bf16.mxu1 %v1151_v0 }
  0x5c   :  { %900 = vmatpush3.bf16.msra.mxu0 %v1264_v6 }
  0x5d   :  { %901 = vmatprep.subr.bf16.mxu0 %v1151_v0  ;;  %920 = vmatpush3.bf16.msra.mxu1 %v1264_v6 }
  0x5e   :  { %921 = vmatprep.subr.bf16.mxu1 %v1151_v0 }
  0x60   :  { %902 = vmatpush3.bf16.msra.mxu0 %v1275_v7 }
  0x61   :  { %903 = vmatprep.subr.bf16.mxu0 %v1151_v0  ;;  %922 = vmatpush3.bf16.msra.mxu1 %v1275_v7 }
  0x62   :  { %923 = vmatprep.subr.bf16.mxu1 %v1151_v0 }
  0x64   :  { %904 = vmatpush3.bf16.msra.mxu0 %v1284_v8 }
  0x65   :  { %924 = vmatpush3.bf16.msra.mxu1 %v1284_v8  ;;  %929 = vmatprep.subr.bf16.mxu0 %v1151_v0 }
  0x66   :  { %949 = vmatprep.subr.bf16.mxu1 %v1151_v0 }
 0x11a   :  { %v152_v12 = vpop.f32.mrb[0].mxu0  ;;  %v194_v13 = vpop.f32.mrb[0].mxu1 }
 0x11b   :  { %v1331_v14 = vadd.f32 %v723_v11, %v152_v12  ;;  %v867_v15 = vpop.f32.mrb[1].mxu0  ;;  %v887_v16 = vpop.f32.mrb[1].mxu1  ;;  %v1091_v11 = vld [vmem:[#allocation5] sm:$0xff]   ;;  %v1092_v12 = vld [vmem:[#allocation5 + $0x8] sm:$0xff]  }
 0x11c   :  { %v155_v17 = vpop.f32.mrb[2].mxu0  ;;  %v197_v18 = vpop.f32.mrb[2].mxu1  ;;  %v1094_v15 = vld [vmem:[#allocation5 + $0x18] sm:$0xff]   ;;  %v1095_v16 = vld [vmem:[#allocation5 + $0x20] sm:$0xff]  }
 0x11d   :  { %v195_v19 = vadd.f32 %v194_v13, %v1331_v14  ;;  %v868_v20 = vpop.f32.mrb[3].mxu0  ;;  %v888_v21 = vpop.f32.mrb[3].mxu1  ;;  %v1093_v13 = vld [vmem:[#allocation5 + $0x10] sm:$0xff]   ;;  %v1096_v17 = vld [vmem:[#allocation5 + $0x28] sm:$0xff]  }
 0x11f   :  { %v200_v22 = vmax.f32 %v195_v19, 0.0 }
 0x121   :  { %v201_v23 = vpack.c.bf16 %v200_v22, %v200_v22 }
 0x123   :  { %906 = vmatmul.mubr.bf16.vlgmr.msra.gmra.mrb[4].mxu0 %v201_v23 }
 0x124   :  { %930 = vmatpush3.bf16.msra.mxu0 %v1223_v1  ;;  %945 = vmatprep.mubr.msk.bf16.mxu0 %vm1152_vm0, %v1151_v0 }
 0x125   :  { %931 = vmatprep.subr.bf16.mxu0 %v1151_v0 }
 0x128   :  { %932 = vmatpush3.bf16.msra.mxu0 %v1230_v2 }
 0x129   :  { %933 = vmatprep.subr.bf16.mxu0 %v1151_v0 }
 0x12c   :  { %934 = vmatpush3.bf16.msra.mxu0 %v1239_v3 }
 0x12d   :  { %935 = vmatprep.subr.bf16.mxu0 %v1151_v0 }
 0x130   :  { %936 = vmatpush3.bf16.msra.mxu0 %v1246_v4 }
 0x131   :  { %937 = vmatprep.subr.bf16.mxu0 %v1151_v0 }
 0x134   :  { %938 = vmatpush3.bf16.msra.mxu0 %v1255_v5 }
 0x135   :  { %939 = vmatprep.subr.bf16.mxu0 %v1151_v0 }
 0x138   :  { %940 = vmatpush3.bf16.msra.mxu0 %v1264_v6 }
 0x139   :  { %941 = vmatprep.subr.bf16.mxu0 %v1151_v0 }
 0x13c   :  { %942 = vmatpush3.bf16.msra.mxu0 %v1275_v7 }
 0x13d   :  { %943 = vmatprep.subr.bf16.mxu0 %v1151_v0 }
 0x140   :  { %944 = vmatpush3.bf16.msra.mxu0 %v1284_v8 }
 0x141   :  { %969 = vmatprep.subr.bf16.mxu0 %v1151_v0 }
 0x1f6   :  { %v236_v24 = vpop.f32.mrb[4].mxu0 }
 0x1f7   :  { %v237_v25 = vadd.f32 %v236_v24, %v1331_v14  ;;  %v907_v26 = vpop.f32.mrb[5].mxu0 }
 0x1f8   :  { %v239_v27 = vpop.f32.mrb[6].mxu0  ;;  %v1098_v26 = vld [vmem:[#allocation5 + $0x38] sm:$0xff]  }
 0x1f9   :  { %v242_v28 = vmax.f32 %v237_v25, 0.0  ;;  %v908_v29 = vpop.f32.mrb[7].mxu0  ;;  %v1097_v25 = vld [vmem:[#allocation5 + $0x30] sm:$0xff]   ;;  %v732_v27 = vld [vmem:[#allocation3 + $0x1] ss:$0 sm:$0xff] }
 0x1fb   :  { %v243_v30 = vpack.c.bf16 %v242_v28, %v242_v28 }
 0x1fd   :  { %926 = vmatmul.mubr.bf16.vlgmr.msra.gmra.mrb[4].mxu1 %v243_v30 }
 0x1fe   :  { %950 = vmatpush3.bf16.msra.mxu1 %v1223_v1  ;;  %965 = vmatprep.mubr.msk.bf16.mxu1 %vm1152_vm0, %v1151_v0 }
 0x1ff   :  { %951 = vmatprep.subr.bf16.mxu1 %v1151_v0 }
 0x202   :  { %952 = vmatpush3.bf16.msra.mxu1 %v1230_v2 }
 0x203   :  { %953 = vmatprep.subr.bf16.mxu1 %v1151_v0 }
 0x206   :  { %954 = vmatpush3.bf16.msra.mxu1 %v1239_v3 }
 0x207   :  { %955 = vmatprep.subr.bf16.mxu1 %v1151_v0 }
 0x20a   :  { %956 = vmatpush3.bf16.msra.mxu1 %v1246_v4 }
 0x20b   :  { %957 = vmatprep.subr.bf16.mxu1 %v1151_v0 }
 0x20e   :  { %958 = vmatpush3.bf16.msra.mxu1 %v1255_v5 }
 0x20f   :  { %959 = vmatprep.subr.bf16.mxu1 %v1151_v0 }
 0x212   :  { %960 = vmatpush3.bf16.msra.mxu1 %v1264_v6 }
 0x213   :  { %961 = vmatprep.subr.bf16.mxu1 %v1151_v0 }
 0x216   :  { %962 = vmatpush3.bf16.msra.mxu1 %v1275_v7 }
 0x217   :  { %963 = vmatprep.subr.bf16.mxu1 %v1151_v0 }
 0x21a   :  { %964 = vmatpush3.bf16.msra.mxu1 %v1284_v8 }
 0x21b   :  { %989 = vmatprep.subr.bf16.mxu1 %v1151_v0 }
 0x2d0   :  { %v278_v31 = vpop.f32.mrb[4].mxu1 }
 0x2d1   :  { %v279_v32 = vadd.f32 %v278_v31, %v1331_v14  ;;  %v927_v33 = vpop.f32.mrb[5].mxu1 }
 0x2d2   :  { %v281_v34 = vpop.f32.mrb[6].mxu1 }
 0x2d3   :  { %v284_v35 = vmax.f32 %v279_v32, 0.0  ;;  %v928_v36 = vpop.f32.mrb[7].mxu1  ;;  %v741_v34 = vld [vmem:[#allocation3 + $0x2] ss:$0 sm:$0xff] }
 0x2d5   :  { %v285_v37 = vpack.c.bf16 %v284_v35, %v284_v35 }
 0x2d7   :  { %946 = vmatmul.mubr.bf16.vlgmr.msra.gmra.mrb[8].mxu0 %v285_v37 }
 0x2d8   :  { %970 = vmatpush3.bf16.msra.mxu0 %v1223_v1  ;;  %985 = vmatprep.mubr.msk.bf16.mxu0 %vm1152_vm0, %v1151_v0 }
 0x2d9   :  { %971 = vmatprep.subr.bf16.mxu0 %v1151_v0 }
 0x2dc   :  { %972 = vmatpush3.bf16.msra.mxu0 %v1230_v2 }
 0x2dd   :  { %973 = vmatprep.subr.bf16.mxu0 %v1151_v0 }
 0x2e0   :  { %974 = vmatpush3.bf16.msra.mxu0 %v1239_v3 }
 0x2e1   :  { %975 = vmatprep.subr.bf16.mxu0 %v1151_v0 }
 0x2e4   :  { %976 = vmatpush3.bf16.msra.mxu0 %v1246_v4 }
 0x2e5   :  { %977 = vmatprep.subr.bf16.mxu0 %v1151_v0 }
 0x2e8   :  { %978 = vmatpush3.bf16.msra.mxu0 %v1255_v5 }
 0x2e9   :  { %979 = vmatprep.subr.bf16.mxu0 %v1151_v0 }
 0x2ec   :  { %980 = vmatpush3.bf16.msra.mxu0 %v1264_v6 }
 0x2ed   :  { %981 = vmatprep.subr.bf16.mxu0 %v1151_v0 }
 0x2f0   :  { %982 = vmatpush3.bf16.msra.mxu0 %v1275_v7 }
 0x2f1   :  { %983 = vmatprep.subr.bf16.mxu0 %v1151_v0 }
 0x2f4   :  { %984 = vmatpush3.bf16.msra.mxu0 %v1284_v8 }
 0x2f5   :  { %1009 = vmatprep.subr.bf16.mxu0 %v1151_v0 }
 0x3aa   :  { %v320_v38 = vpop.f32.mrb[8].mxu0 }
 0x3ab   :  { %v321_v39 = vadd.f32 %v320_v38, %v1331_v14  ;;  %v947_v40 = vpop.f32.mrb[9].mxu0 }
 0x3ac   :  { %v323_v41 = vpop.f32.mrb[10].mxu0 }
 0x3ad   :  { %v326_v42 = vmax.f32 %v321_v39, 0.0  ;;  %v948_v43 = vpop.f32.mrb[11].mxu0 }
 0x3af   :  { %v327_v44 = vpack.c.bf16 %v326_v42, %v326_v42 }
 0x3b1   :  { %966 = vmatmul.mubr.bf16.vlgmr.msra.gmra.mrb[8].mxu1 %v327_v44 }
 0x3b2   :  { %990 = vmatpush3.bf16.msra.mxu1 %v1223_v1  ;;  %1005 = vmatprep.mubr.msk.bf16.mxu1 %vm1152_vm0, %v1151_v0 }
 0x3b3   :  { %991 = vmatprep.subr.bf16.mxu1 %v1151_v0 }
 0x3b6   :  { %992 = vmatpush3.bf16.msra.mxu1 %v1230_v2 }
 0x3b7   :  { %993 = vmatprep.subr.bf16.mxu1 %v1151_v0 }
 0x3ba   :  { %994 = vmatpush3.bf16.msra.mxu1 %v1239_v3 }
 0x3bb   :  { %995 = vmatprep.subr.bf16.mxu1 %v1151_v0 }
 0x3be   :  { %996 = vmatpush3.bf16.msra.mxu1 %v1246_v4 }
 0x3bf   :  { %997 = vmatprep.subr.bf16.mxu1 %v1151_v0 }
 0x3c2   :  { %998 = vmatpush3.bf16.msra.mxu1 %v1255_v5 }
 0x3c3   :  { %999 = vmatprep.subr.bf16.mxu1 %v1151_v0 }
 0x3c6   :  { %1000 = vmatpush3.bf16.msra.mxu1 %v1264_v6 }
 0x3c7   :  { %1001 = vmatprep.subr.bf16.mxu1 %v1151_v0 }
 0x3ca   :  { %1002 = vmatpush3.bf16.msra.mxu1 %v1275_v7 }
 0x3cb   :  { %1003 = vmatprep.subr.bf16.mxu1 %v1151_v0 }
 0x3ce   :  { %1004 = vmatpush3.bf16.msra.mxu1 %v1284_v8 }
 0x3cf   :  { %1029 = vmatprep.subr.bf16.mxu1 %v1151_v0 }
 0x484   :  { %v362_v45 = vpop.f32.mrb[8].mxu1 }
 0x485   :  { %v363_v46 = vadd.f32 %v362_v45, %v1331_v14  ;;  %v967_v47 = vpop.f32.mrb[9].mxu1 }
 0x486   :  { %v365_v48 = vpop.f32.mrb[10].mxu1 }
 0x487   :  { %v368_v49 = vmax.f32 %v363_v46, 0.0  ;;  %v968_v50 = vpop.f32.mrb[11].mxu1 }
 0x489   :  { %v369_v51 = vpack.c.bf16 %v368_v49, %v368_v49 }
 0x48b   :  { %986 = vmatmul.mubr.bf16.vlgmr.msra.gmra.mrb[12].mxu0 %v369_v51 }
 0x48c   :  { %1010 = vmatpush3.bf16.msra.mxu0 %v1223_v1  ;;  %1025 = vmatprep.mubr.msk.bf16.mxu0 %vm1152_vm0, %v1151_v0  ;;  %v1088_v1 = vld [vmem:[%s1479_s3 + $0x28] sm:$0xff]  }
 0x48d   :  { %1011 = vmatprep.subr.bf16.mxu0 %v1151_v0 }
 0x490   :  { %1012 = vmatpush3.bf16.msra.mxu0 %v1230_v2 }
 0x491   :  { %1013 = vmatprep.subr.bf16.mxu0 %v1151_v0 }
 0x494   :  { %1014 = vmatpush3.bf16.msra.mxu0 %v1239_v3 }
 0x495   :  { %1015 = vmatprep.subr.bf16.mxu0 %v1151_v0 }
 0x498   :  { %1016 = vmatpush3.bf16.msra.mxu0 %v1246_v4 }
 0x499   :  { %1017 = vmatprep.subr.bf16.mxu0 %v1151_v0 }
 0x49c   :  { %1018 = vmatpush3.bf16.msra.mxu0 %v1255_v5 }
 0x49d   :  { %1019 = vmatprep.subr.bf16.mxu0 %v1151_v0 }
 0x4a0   :  { %1020 = vmatpush3.bf16.msra.mxu0 %v1264_v6 }
 0x4a1   :  { %1021 = vmatprep.subr.bf16.mxu0 %v1151_v0 }
 0x4a4   :  { %1022 = vmatpush3.bf16.msra.mxu0 %v1275_v7 }
 0x4a5   :  { %1023 = vmatprep.subr.bf16.mxu0 %v1151_v0 }
 0x4a8   :  { %1024 = vmatpush3.bf16.msra.mxu0 %v1284_v8 }
 0x4a9   :  { %1049 = vmatprep.subr.bf16.mxu0 %v1151_v0 }
 0x55e   :  { %v404_v52 = vpop.f32.mrb[12].mxu0 }
 0x55f   :  { %v405_v53 = vadd.f32 %v404_v52, %v1331_v14  ;;  %v987_v54 = vpop.f32.mrb[13].mxu0 }
 0x560   :  { %v407_v55 = vpop.f32.mrb[14].mxu0 }
 0x561   :  { %v410_v56 = vmax.f32 %v405_v53, 0.0  ;;  %v988_v57 = vpop.f32.mrb[15].mxu0 }
 0x563   :  { %v411_v58 = vpack.c.bf16 %v410_v56, %v410_v56 }
 0x565   :  { %1006 = vmatmul.mubr.bf16.vlgmr.msra.gmra.mrb[12].mxu1 %v411_v58 }
 0x566   :  { %1045 = vmatprep.mubr.msk.bf16.mxu1 %vm1152_vm0, %v1151_v0  ;;  %1030 = vmatpush3.bf16.msra.mxu1 %v1083_v59 }
 0x567   :  { %1031 = vmatprep.subr.bf16.mxu1 %v1151_v0 }
 0x56a   :  { %1032 = vmatpush3.bf16.msra.mxu1 %v1084_v60 }
 0x56b   :  { %1033 = vmatprep.subr.bf16.mxu1 %v1151_v0 }
 0x56e   :  { %1034 = vmatpush3.bf16.msra.mxu1 %v1085_v61 }
 0x56f   :  { %1035 = vmatprep.subr.bf16.mxu1 %v1151_v0 }
 0x572   :  { %1036 = vmatpush3.bf16.msra.mxu1 %v1086_v62 }
 0x573   :  { %1037 = vmatprep.subr.bf16.mxu1 %v1151_v0 }
 0x576   :  { %1038 = vmatpush3.bf16.msra.mxu1 %v1087_v63 }
 0x577   :  { %1039 = vmatprep.subr.bf16.mxu1 %v1151_v0 }
 0x57a   :  { %1040 = vmatpush3.bf16.msra.mxu1 %v1088_v1 }
 0x57b   :  { %1041 = vmatprep.subr.bf16.mxu1 %v1151_v0 }
 0x57e   :  { %1042 = vmatpush3.bf16.msra.mxu1 %v1089_v9 }
 0x57f   :  { %1043 = vmatprep.subr.bf16.mxu1 %v1151_v0 }
 0x582   :  { %1044 = vmatpush3.bf16.msra.mxu1 %v1090_v10 }
 0x638   :  { %v446_v2 = vpop.f32.mrb[12].mxu1 }
 0x639   :  { %v447_v3 = vadd.f32 %v446_v2, %v1331_v14  ;;  %v1007_v4 = vpop.f32.mrb[13].mxu1 }
 0x63a   :  { %v449_v5 = vpop.f32.mrb[14].mxu1 }
 0x63b   :  { %v452_v6 = vmax.f32 %v447_v3, 0.0  ;;  %v1008_v7 = vpop.f32.mrb[15].mxu1 }
 0x63d   :  { %v453_v8 = vpack.c.bf16 %v452_v6, %v452_v6 }
 0x63f   :  { %1026 = vmatmul.mubr.bf16.vlgmr.msra.gmra.mrb[16].mxu0 %v453_v8 }
 0x640   :  { %1065 = vmatprep.mubr.msk.bf16.mxu0 %vm1152_vm0, %v1151_v0  ;;  %1050 = vmatpush3.bf16.msra.mxu0 %v1091_v11 }
 0x641   :  { %1051 = vmatprep.subr.bf16.mxu0 %v1151_v0 }
 0x644   :  { %1052 = vmatpush3.bf16.msra.mxu0 %v1092_v12 }
 0x645   :  { %1053 = vmatprep.subr.bf16.mxu0 %v1151_v0 }
 0x648   :  { %1054 = vmatpush3.bf16.msra.mxu0 %v1093_v13 }
 0x649   :  { %1055 = vmatprep.subr.bf16.mxu0 %v1151_v0 }
 0x64c   :  { %1056 = vmatpush3.bf16.msra.mxu0 %v1094_v15 }
 0x64d   :  { %1057 = vmatprep.subr.bf16.mxu0 %v1151_v0 }
 0x650   :  { %1058 = vmatpush3.bf16.msra.mxu0 %v1095_v16 }
 0x651   :  { %1059 = vmatprep.subr.bf16.mxu0 %v1151_v0 }
 0x654   :  { %1060 = vmatpush3.bf16.msra.mxu0 %v1096_v17 }
 0x655   :  { %1061 = vmatprep.subr.bf16.mxu0 %v1151_v0 }
 0x658   :  { %1062 = vmatpush3.bf16.msra.mxu0 %v1097_v25 }
 0x659   :  { %1063 = vmatprep.subr.bf16.mxu0 %v1151_v0 }
 0x65c   :  { %1064 = vmatpush3.bf16.msra.mxu0 %v1098_v26 }
 0x712   :  { %v488_v18 = vpop.f32.mrb[16].mxu0 }
 0x713   :  { %v489_v19 = vadd.f32 %v488_v18, %v1331_v14  ;;  %v1027_v20 = vpop.f32.mrb[17].mxu0 }
 0x714   :  { %v491_v21 = vpop.f32.mrb[18].mxu0 }
 0x715   :  { %v494_v22 = vmax.f32 %v489_v19, 0.0  ;;  %v1028_v23 = vpop.f32.mrb[19].mxu0 }
 0x717   :  { %v497_v24 = vpack.c.bf16 %v494_v22, %v494_v22 }
 0x719   :  { %1046 = vmatmul.mubr.bf16.vlgmr.msra.gmra.mrb[16].mxu1 %v497_v24 }
 0x7ec   :  { %v600_v28 = vpop.f32.mrb[16].mxu1 }
 0x7ed   :  { %v601_v29 = vadd.f32 %v732_v27, %v600_v28  ;;  %v1047_v30 = vpop.f32.mrb[17].mxu1 }
 0x7ee   :  { %v603_v31 = vpop.f32.mrb[18].mxu1 }
 0x7ef   :  { %v606_v32 = vmax.f32 %v601_v29, 0.0  ;;  %v1048_v33 = vpop.f32.mrb[19].mxu1 }
 0x7f1   :  { %v607_v14 = vpack.c.bf16 %v606_v32, %v606_v32 }
 0x7f3   :  { %1066 = vmatmul.mubr.bf16.vlgmr.msra.gmra.mrb[20].mxu0 %v607_v14 }
 0x8c6   :  { %v710_v35 = vpop.f32.mrb[20].mxu0 }
 0x8c7   :  { %v711_v36 = vadd.f32 %v741_v34, %v710_v35  ;;  %v1067_v37 = vpop.f32.mrb[21].mxu0 }
 0x8c8   :  { %v713_v38 = vpop.f32.mrb[22].mxu0 }
 0x8c9   :  { %716 = vst [vmem:[%s1481_s5] sm:$0xff] %v711_v36  ;;  %v1068_v0 = vpop.f32.mrb[23].mxu0 }
 0x8ca   :  { %721 = vsyncpa [#allocation4], 1 }
 0x8cb   :  { %722 = vsyncpa [#allocation6], 1 }

</bundles_post_ra>
